<compile_context>
chip_gen: v6e
topology: v6e:2x2x1
jax: 0.10.0
libtpu: 0.0.40
codegen_flags: <defaults>
</compile_context>

<pallas_src>
import jax
import jax.numpy as jnp
from jax.experimental import pallas as pl
from jax.experimental.pallas import tpu as pltpu


def mlp_kernel(x_ref, w1_ref, b1_ref, w2_ref, b2_ref, o_ref):
    # fc1: (tb, size_in) @ (size_in, hidden) -> (tb, hidden), f32 accumulate on MXU
    h = jnp.dot(x_ref[...], w1_ref[...], preferred_element_type=jnp.float32)
    h = h + b1_ref[...]                       # bias broadcast (1, hidden)

    # LeakyReLU(negative_slope=0.1): max(h, 0.1*h) == leaky_relu for slope in (0,1)
    h = jnp.maximum(h, 0.1 * h)

    # BatchNorm1d (eval) folded into w2/b2 outside the kernel; Dropout (eval) == id.

    # fc2: (tb, hidden) @ (hidden, size_out) -> (tb, size_out)
    out = jnp.dot(h, w2_ref[...], preferred_element_type=jnp.float32)
    o_ref[...] = (out + b2_ref[...]).astype(o_ref.dtype)


def _fold_bn_into_fc2(params, eps=1e-5):
    """Absorb eval-mode BatchNorm (normalize + affine) into fc2's weights/bias."""
    scale = params["gamma"] * jax.lax.rsqrt(params["running_var"] + eps)  # (1, H)
    shift = params["beta"] - params["running_mean"] * scale               # (1, H)
    w2_eff = scale.reshape(-1, 1) * params["w2"]                          # (H, O)
    b2_eff = params["b2"] + shift @ params["w2"]                          # (1, O)
    return w2_eff, b2_eff


def mlp_forward(x, params, *, tb=None):
    """x: (B, size_in) float32.  params: dict of weights (see init_params)."""
    B, size_in = x.shape
    hidden = params["w1"].shape[1]
    size_out = params["w2"].shape[1]

    if tb is None:
        # Full batch per step (amortizes per-step pipeline overhead), capped so
        # the activation tile stays comfortably inside VMEM on all generations
        # (v7x has only 64 MiB physical VMEM).
        tb = B if B <= 256 else 256
    assert B % tb == 0, "batch must be divisible by the batch tile"
    grid = (B // tb,)

    w2_eff, b2_eff = _fold_bn_into_fc2(params)

    def row_map(i):
        return (i, 0)

    def rep_map(i):
        return (0, 0)

    itemsize = 4  # f32
    cost = pl.CostEstimate(
        flops=2 * B * hidden * (size_in + size_out),
        transcendentals=0,
        bytes_accessed=itemsize * (B * size_in + size_in * hidden + hidden
                                   + hidden * size_out + size_out
                                   + B * size_out),
    )

    return pl.pallas_call(
        mlp_kernel,
        out_shape=jax.ShapeDtypeStruct((B, size_out), jnp.float32),
        grid_spec=pltpu.PrefetchScalarGridSpec(
            num_scalar_prefetch=0,
            grid=grid,
            in_specs=[
                pl.BlockSpec((tb, size_in), row_map),        # x tile
                pl.BlockSpec((size_in, hidden), rep_map),    # w1
                pl.BlockSpec((1, hidden), rep_map),          # b1
                pl.BlockSpec((hidden, size_out), rep_map),   # w2 (BN-folded)
                pl.BlockSpec((1, size_out), rep_map),        # b2 (BN-folded)
            ],
            out_specs=pl.BlockSpec((tb, size_out), row_map),
        ),
        compiler_params=pltpu.CompilerParams(
            dimension_semantics=("parallel",)),
        cost_estimate=cost,
    )(x, params["w1"], params["b1"], w2_eff, b2_eff)


def init_params(key, size_in, hidden, size_out):
    """Deterministic init mimicking nn.Linear (uniform +/- 1/sqrt(fan_in)) and a
    freshly-constructed BatchNorm1d (gamma=1, beta=0, mean=0, var=1)."""
    k1, k2, k3, k4 = jax.random.split(key, 4)
    bound1 = 1.0 / jnp.sqrt(size_in)
    bound2 = 1.0 / jnp.sqrt(hidden)
    return {
        # stored as (in, out) == transpose of PyTorch's (out, in)
        "w1": jax.random.uniform(k1, (size_in, hidden), jnp.float32, -bound1, bound1),
        "b1": jax.random.uniform(k2, (1, hidden), jnp.float32, -bound1, bound1),
        "w2": jax.random.uniform(k3, (hidden, size_out), jnp.float32, -bound2, bound2),
        "b2": jax.random.uniform(k4, (1, size_out), jnp.float32, -bound2, bound2),
        "gamma": jnp.ones((1, hidden), jnp.float32),
        "beta": jnp.zeros((1, hidden), jnp.float32),
        "running_mean": jnp.zeros((1, hidden), jnp.float32),
        "running_var": jnp.ones((1, hidden), jnp.float32),
    }


def mlp_reference(x, p):
    """Unfolded reference (fc1 -> LeakyReLU -> eval-BN -> Dropout(eval) -> fc2)."""
    h = x @ p["w1"] + p["b1"]
    h = jnp.where(h >= 0, h, 0.1 * h)
    h = (h - p["running_mean"]) * jax.lax.rsqrt(p["running_var"] + 1e-5) \
        * p["gamma"] + p["beta"]
    return h @ p["w2"] + p["b2"]


if __name__ == "__main__":
    B, SIZE_IN, HIDDEN, SIZE_OUT = 16, 128, 128, 128

    key = jax.random.PRNGKey(0)
    kx, kp = jax.random.split(key)
    x = jax.random.normal(kx, (B, SIZE_IN), jnp.float32)
    params = init_params(kp, SIZE_IN, HIDDEN, SIZE_OUT)

    fwd = jax.jit(mlp_forward)            # BN fold + pallas_call compiled together
    out = fwd(x, params)                  # auto tile -> tb=B, grid=(1,)
    out = jax.block_until_ready(out)

    ref = mlp_reference(x, params)
    assert out.shape == (B, SIZE_OUT)
    assert jnp.allclose(out, ref, atol=1e-4, rtol=1e-4)

    print("KERNEL_OK")
</pallas_src>

<mosaic_0001>
module attributes {stable_mosaic.version = 11 : i64} {
  func.func @mlp_kernel(%arg0: i32, %arg1: memref<16x128xf32, #tpu.memory_space<vmem>>, %arg2: memref<128x128xf32, #tpu.memory_space<vmem>>, %arg3: memref<1x128xf32, #tpu.memory_space<vmem>>, %arg4: memref<128x128xf32, #tpu.memory_space<vmem>>, %arg5: memref<1x128xf32, #tpu.memory_space<vmem>>, %arg6: memref<16x128xf32, #tpu.memory_space<vmem>>) attributes {dimension_semantics = [#tpu.dimension_semantics<parallel>], iteration_bounds = array<i64: 1>, scalar_prefetch = 0 : i64, scratch_operands = 0 : i64, tpu.core_type = #tpu.core_type<tc>, window_params = [{transform_indices = @transform_0, window_bounds = array<i64: 16, 128>}, {pipeline_mode = #tpu.pipeline_mode<synchronous>, transform_indices = @transform_1, window_bounds = array<i64: 128, 128>}, {pipeline_mode = #tpu.pipeline_mode<synchronous>, transform_indices = @transform_2, window_bounds = array<i64: 1, 128>}, {pipeline_mode = #tpu.pipeline_mode<synchronous>, transform_indices = @transform_3, window_bounds = array<i64: 128, 128>}, {pipeline_mode = #tpu.pipeline_mode<synchronous>, transform_indices = @transform_4, window_bounds = array<i64: 1, 128>}, {transform_indices = @transform_5, window_bounds = array<i64: 16, 128>}]} {
    %c0 = arith.constant 0 : index
    %c0_0 = arith.constant 0 : index
    %0 = vector.load %arg1[%c0, %c0_0] : memref<16x128xf32, #tpu.memory_space<vmem>>, vector<16x128xf32>
    %c0_1 = arith.constant 0 : index
    %c0_2 = arith.constant 0 : index
    %1 = vector.load %arg2[%c0_1, %c0_2] : memref<128x128xf32, #tpu.memory_space<vmem>>, vector<128x128xf32>
    %cst = arith.constant dense<0.000000e+00> : vector<16x128xf32>
    %2 = tpu.matmul %0, %1, %cst {dimension_numbers = #tpu.dot_dimension_numbers<[1], [0], [0], [1], [0, 0, 1, 1], [], []>} : vector<16x128xf32>, vector<128x128xf32>, vector<16x128xf32> -> vector<16x128xf32>
    %c0_3 = arith.constant 0 : index
    %c0_4 = arith.constant 0 : index
    %3 = vector.load %arg3[%c0_3, %c0_4] : memref<1x128xf32, #tpu.memory_space<vmem>>, vector<1x128xf32>
    %4 = vector.broadcast %3 : vector<1x128xf32> to vector<16x128xf32>
    %5 = arith.addf %2, %4 : vector<16x128xf32>
    %cst_5 = arith.constant 1.000000e-01 : f32
    %6 = vector.broadcast %cst_5 : f32 to vector<16x128xf32>
    %7 = arith.mulf %6, %5 : vector<16x128xf32>
    %8 = arith.maximumf %5, %7 : vector<16x128xf32>
    %c0_6 = arith.constant 0 : index
    %c0_7 = arith.constant 0 : index
    %9 = vector.load %arg4[%c0_6, %c0_7] : memref<128x128xf32, #tpu.memory_space<vmem>>, vector<128x128xf32>
    %cst_8 = arith.constant dense<0.000000e+00> : vector<16x128xf32>
    %10 = tpu.matmul %8, %9, %cst_8 {dimension_numbers = #tpu.dot_dimension_numbers<[1], [0], [0], [1], [0, 0, 1, 1], [], []>} : vector<16x128xf32>, vector<128x128xf32>, vector<16x128xf32> -> vector<16x128xf32>
    %c0_9 = arith.constant 0 : index
    %c0_10 = arith.constant 0 : index
    %11 = vector.load %arg5[%c0_9, %c0_10] : memref<1x128xf32, #tpu.memory_space<vmem>>, vector<1x128xf32>
    %12 = vector.broadcast %11 : vector<1x128xf32> to vector<16x128xf32>
    %13 = arith.addf %10, %12 : vector<16x128xf32>
    %c0_11 = arith.constant 0 : index
    %c0_12 = arith.constant 0 : index
    %14 = vector.load %arg6[%c0_11, %c0_12] : memref<16x128xf32, #tpu.memory_space<vmem>>, vector<16x128xf32>
    tpu.vector_store %arg6[%c0_11, %c0_12], %13 {strides = array<i32>} : memref<16x128xf32, #tpu.memory_space<vmem>>, vector<16x128xf32>,
    return
  }
  func.func @transform_0(%arg0: i32) -> (i32, i32) {
    %c0_i32 = arith.constant 0 : i32
    %c0_i32_0 = arith.constant 0 : i32
    return %arg0, %c0_i32 : i32, i32
  }
  func.func @transform_1(%arg0: i32) -> (i32, i32) {
    %c0_i32 = arith.constant 0 : i32
    %c0_i32_0 = arith.constant 0 : i32
    %c0_i32_1 = arith.constant 0 : i32
    return %c0_i32, %c0_i32_0 : i32, i32
  }
  func.func @transform_2(%arg0: i32) -> (i32, i32) {
    %c0_i32 = arith.constant 0 : i32
    %c0_i32_0 = arith.constant 0 : i32
    %c0_i32_1 = arith.constant 0 : i32
    return %c0_i32, %c0_i32_0 : i32, i32
  }
  func.func @transform_3(%arg0: i32) -> (i32, i32) {
    %c0_i32 = arith.constant 0 : i32
    %c0_i32_0 = arith.constant 0 : i32
    %c0_i32_1 = arith.constant 0 : i32
    return %c0_i32, %c0_i32_0 : i32, i32
  }
  func.func @transform_4(%arg0: i32) -> (i32, i32) {
    %c0_i32 = arith.constant 0 : i32
    %c0_i32_0 = arith.constant 0 : i32
    %c0_i32_1 = arith.constant 0 : i32
    return %c0_i32, %c0_i32_0 : i32, i32
  }
  func.func @transform_5(%arg0: i32) -> (i32, i32) {
    %c0_i32 = arith.constant 0 : i32
    %c0_i32_0 = arith.constant 0 : i32
    return %arg0, %c0_i32 : i32, i32
  }
}

</mosaic_0001>

<bundles_post_ra>
// kernel: mlp_forward.1
= control target key start
LH: loop header
LB: loop body
LE: loop exit
PB: predicated region body
PF: predicated region fallthrough
CT: control target
= control target key end

     0   :  { %s518_s0 = inlined_call_operand.vmem [shape: f32[16,128], index: 0, kind: input, shape index: {}]   ;;  %s519_s1 = inlined_call_operand.vmem [shape: f32[128,128], index: 1, kind: input, shape index: {}]   ;;  %s520_s2 = inlined_call_operand.vmem [shape: f32[1,128], index: 2, kind: input, shape index: {}]   ;;  %s521_s3 = inlined_call_operand.vmem [shape: f32[128,128], index: 3, kind: input, shape index: {}]   ;;  %s522_s4 = inlined_call_operand.vmem [shape: f32[1,128], index: 4, kind: input, shape index: {}]   ;;  %s523_s5 = inlined_call_operand.hbm [shape: f32[16,128], index: 5, kind: output, shape index: {}]  }
   0x1   :  { %v38_v0 = vld [vmem:[%s519_s1 + $0x78] sm:$0xff]  ;;  %v37_v1 = vld [vmem:[%s519_s1 + $0x70] sm:$0xff]  ;;  %v36_v2 = vld [vmem:[%s519_s1 + $0x68] sm:$0xff] }
   0x2   :  { %279 = vmatprep.subr.mxu0 %v38_v0  ;;  %v35_v3 = vld [vmem:[%s519_s1 + $0x60] sm:$0xff]  ;;  %v34_v5 = vld [vmem:[%s519_s1 + $0x58] sm:$0xff]  ;;  %v139_v7 = vld [vmem:[%s521_s3 + $0x70] sm:$0xff] }
   0x3   :  { %280 = vmatpush3.msra.mxu0 %v38_v0  ;;  %v21_v4 = vld [vmem:[%s518_s0] sm:$0xff]  ;;  %v140_v6 = vld [vmem:[%s521_s3 + $0x78] sm:$0xff]  ;;  %v33_v8 = vld [vmem:[%s519_s1 + $0x50] sm:$0xff] }
   0x4   :  { %281 = vmatprep.subr.mxu0 %v37_v1  ;;  %311 = vmatprep.mubr.f32.mxu0 %v21_v4  ;;  %v138_v9 = vld [vmem:[%s521_s3 + $0x68] sm:$0xff] }
   0x5   :  { %282 = vmatpush3.msra.mxu0 %v37_v1  ;;  %314 = vmatprep.subr.mxu1 %v140_v6 }
   0x6   :  { %283 = vmatprep.subr.mxu0 %v36_v2  ;;  %315 = vmatpush3.msra.mxu1 %v140_v6 }
   0x7   :  { %284 = vmatpush3.msra.mxu0 %v36_v2  ;;  %316 = vmatprep.subr.mxu1 %v139_v7 }
   0x8   :  { %285 = vmatprep.subr.mxu0 %v35_v3 }
   0x9   :  { %286 = vmatpush3.msra.mxu0 %v35_v3 }
   0xa   :  { %287 = vmatprep.subr.mxu0 %v34_v5 }
   0xb   :  { %10 = vsyncpa [#allocation3], 0  ;;  %288 = vmatpush3.msra.mxu0 %v34_v5  ;;  %v32_v10 = vld [vmem:[%s519_s1 + $0x48] sm:$0xff]  ;;  %317 = vmatpush3.msra.mxu1 %v139_v7  ;;  %v137_v11 = vld [vmem:[%s521_s3 + $0x60] sm:$0xff]  ;;  %s374_s12 = smov [#allocation2]  }
   0xc   :  { %289 = vmatprep.subr.mxu0 %v33_v8  ;;  %318 = vmatprep.subr.mxu1 %v138_v9  ;;  %v31_v12 = vld [vmem:[%s519_s1 + $0x40] sm:$0xff]  ;;  %v136_v13 = vld [vmem:[%s521_s3 + $0x58] sm:$0xff]  ;;  %v135_v15 = vld [vmem:[%s521_s3 + $0x50] sm:$0xff]  ;;  %s230_s13 = sshll.u32 %s374_s12, 4  ;;  %s231_s13 = int_to_ptr.vmem [resolvable:$true] %s230_s13 }
   0xd   :  { %290 = vmatpush3.msra.mxu0 %v33_v8  ;;  %319 = vmatpush3.msra.mxu1 %v138_v9  ;;  %v30_v14 = vld [vmem:[%s519_s1 + $0x38] sm:$0xff]  ;;  %v29_v16 = vld [vmem:[%s519_s1 + $0x30] sm:$0xff]  ;;  %v134_v17 = vld [vmem:[%s521_s3 + $0x48] sm:$0xff]  ;;  %p357_p1 = scmp.lt.s32.totalorder %s231_s13, %s231_s13 }
   0xe   :  { %291 = vmatprep.subr.mxu0 %v32_v10  ;;  %320 = vmatprep.subr.mxu1 %v137_v11  ;;  %v28_v18 = vld [vmem:[%s519_s1 + $0x28] sm:$0xff]  ;;  %v133_v19 = vld [vmem:[%s521_s3 + $0x40] sm:$0xff]  ;;  %v132_v21 = vld [vmem:[%s521_s3 + $0x38] sm:$0xff] }
   0xf   :  { %292 = vmatpush3.msra.mxu0 %v32_v10  ;;  %321 = vmatpush3.msra.mxu1 %v137_v11  ;;  %v27_v20 = vld [vmem:[%s519_s1 + $0x20] sm:$0xff]  ;;  %v26_v22 = vld [vmem:[%s519_s1 + $0x18] sm:$0xff]  ;;  %v131_v23 = vld [vmem:[%s521_s3 + $0x30] sm:$0xff] }
  0x10   :  { %293 = vmatprep.subr.mxu0 %v31_v12  ;;  %322 = vmatprep.subr.mxu1 %v136_v13  ;;  %v25_v24 = vld [vmem:[%s519_s1 + $0x10] sm:$0xff]  ;;  %v130_v25 = vld [vmem:[%s521_s3 + $0x28] sm:$0xff]  ;;  %v23_v27 = vld [vmem:[%s519_s1] sm:$0xff] }
  0x11   :  { %294 = vmatpush3.msra.mxu0 %v31_v12  ;;  %323 = vmatpush3.msra.mxu1 %v136_v13  ;;  %v24_v26 = vld [vmem:[%s519_s1 + $0x8] sm:$0xff]  ;;  %v129_v29 = vld [vmem:[%s521_s3 + $0x20] sm:$0xff]  ;;  %v128_v30 = vld [vmem:[%s521_s3 + $0x18] sm:$0xff] }
  0x12   :  { %295 = vmatprep.subr.mxu0 %v30_v14  ;;  %324 = vmatprep.subr.mxu1 %v135_v15  ;;  %v22_v28 = vld [vmem:[%s518_s0 + $0x8] sm:$0xff]  ;;  %v127_v31 = vld [vmem:[%s521_s3 + $0x10] sm:$0xff]  ;;  %v125_v33 = vld [vmem:[%s521_s3] sm:$0xff] }
  0x13   :  { %296 = vmatpush3.msra.mxu0 %v30_v14  ;;  %325 = vmatpush3.msra.mxu1 %v135_v15  ;;  %v126_v32 = vld [vmem:[%s521_s3 + $0x8] sm:$0xff]  ;;  %v241_v34 = vld [vmem:[%s520_s2] ss:$0 sm:$0xff]  ;;  %s352_s2 = scalar_lea.vmem %s231_s13, 256 }
  0x14   :  { %297 = vmatprep.subr.mxu0 %v29_v16  ;;  %326 = vmatprep.subr.mxu1 %v134_v17  ;;  %v242_v43 = vld [vmem:[%s522_s4] ss:$0 sm:$0xff]  ;;  %p353_p0 = scmp.ne.s32.totalorder %s231_s13, %s352_s2  ;;  %p358_p2 = scmp.lt.s32.totalorder %s352_s2, %s352_s2 }
  0x15   :  { %298 = vmatpush3.msra.mxu0 %v29_v16  ;;  %327 = vmatpush3.msra.mxu1 %v134_v17 }
  0x16   :  { %299 = vmatprep.subr.mxu0 %v28_v18  ;;  %328 = vmatprep.subr.mxu1 %v133_v19  ;;  %p359_p3 = por %p358_p2, %p357_p1 }
  0x17   :  { %300 = vmatpush3.msra.mxu0 %v28_v18  ;;  %329 = vmatpush3.msra.mxu1 %v133_v19 }
  0x18   :  { %301 = vmatprep.subr.mxu0 %v27_v20  ;;  %330 = vmatprep.subr.mxu1 %v132_v21  ;;  %p360_p4 = pnand %p359_p3, %p353_p0 }
  0x19   :  { %302 = vmatpush3.msra.mxu0 %v27_v20  ;;  %331 = vmatpush3.msra.mxu1 %v132_v21 }
  0x1a   :  { %303 = vmatprep.subr.mxu0 %v26_v22  ;;  %332 = vmatprep.subr.mxu1 %v131_v23 }
  0x1b   :  { %304 = vmatpush3.msra.mxu0 %v26_v22  ;;  %333 = vmatpush3.msra.mxu1 %v131_v23 }
  0x1c   :  { %305 = vmatprep.subr.mxu0 %v25_v24  ;;  %334 = vmatprep.subr.mxu1 %v130_v25 }
  0x1d   :  { %306 = vmatpush3.msra.mxu0 %v25_v24  ;;  %335 = vmatpush3.msra.mxu1 %v130_v25 }
  0x1e   :  { %307 = vmatprep.subr.mxu0 %v24_v26  ;;  %336 = vmatprep.subr.mxu1 %v129_v29 }
  0x1f   :  { %308 = vmatpush3.msra.mxu0 %v24_v26  ;;  %337 = vmatpush3.msra.mxu1 %v129_v29 }
  0x20   :  { %309 = vmatprep.subr.mxu0 %v23_v27  ;;  %338 = vmatprep.subr.mxu1 %v128_v30 }
  0x21   :  { %310 = vmatpush3.msra.mxu0 %v23_v27  ;;  %339 = vmatpush3.msra.mxu1 %v128_v30 }
  0x22   :  { %312 = vmatmul.mubr.f32.vlgmr.msra.gmra.mxu0 %v22_v28  ;;  %340 = vmatprep.subr.mxu1 %v127_v31 }
  0x23   :  { %341 = vmatpush3.msra.mxu1 %v127_v31 }
  0x24   :  { %342 = vmatprep.subr.mxu1 %v126_v32 }
  0x25   :  { %343 = vmatpush3.msra.mxu1 %v126_v32 }
  0x26   :  { %344 = vmatprep.subr.mxu1 %v125_v33 }
  0x27   :  { %345 = vmatpush3.msra.mxu1 %v125_v33 }
  0xe2   :  { %v313_v35 = vpop.f32.mrf.mxu0 }
  0xe3   :  { %v118_v36 = vadd.f32 %v313_v35, %v241_v34 }
  0xe4   :  { %v112_v37 = vpop.f32.mrf.mxu0 }
  0xe5   :  { %v113_v38 = vadd.f32 %v241_v34, %v112_v37  ;;  %v122_v39 = vmul.f32 0.1, %v118_v36 }
  0xe7   :  { %v121_v40 = vmul.f32 0.1, %v113_v38  ;;  %v124_v42 = vmax.f32 %v118_v36, %v122_v39 }
  0xe9   :  { %v123_v41 = vmax.f32 %v113_v38, %v121_v40 }
  0xeb   :  { %346 = vmatprep.mubr.f32.mxu1 %v123_v41 }
  0xec   :  { %347 = vmatmul.mubr.f32.vlgmr.msra.gmra.mxu1 %v124_v42 }
 0x1ac   :  { %v348_v44 = vpop.f32.mrf.mxu1 }
 0x1ad   :  { %v220_v45 = vadd.f32 %v348_v44, %v242_v43 }
 0x1ae   :  { %v214_v46 = vpop.f32.mrf.mxu1 }
 0x1af   :  { %224 = vst [vmem:[#allocation2 + $0x8] sm:$0xff] %v220_v45  ;;  %v215_v47 = vadd.f32 %v242_v43, %v214_v46 }
 0x1b1   :  { %223 = vst [vmem:[#allocation2] sm:$0xff] %v215_v47 }
 0x1b2   :  { %363 = shalt.err (!%p360_p4)
}
 0x1b3   :  { %s375_s14 = smov 128   ;;  %s376_s15 = smov 8  }
 0x1b4   :  { %236 = dma.vmem_to_hbm [thread:$0]  %s231_s13, 256, %s523_s5, [#allocation3], %s375_s14, %s375_s14, %s376_s15  }
 0x1b5   :  { %372 = dma.done.wait [#allocation3], 256  }
 0x1b6   :  { %373 = vsyncadd [#allocation3], 4294967040 }
 0x1b7   :  { %240 = vsyncpa [#allocation3], 1 }

</bundles_post_ra>
